<compile_context>
chip_gen: v5e
topology: v5e:2x2
jax: 0.10.0
libtpu: 0.0.40
codegen_flags: <defaults>
</compile_context>

<pallas_src>
import jax
import jax.numpy as jnp
from jax.experimental import pallas as pl
from jax.experimental.pallas import tpu as pltpu


# ----------------------------------------------------------------------------
# Kernel
# ----------------------------------------------------------------------------
def _head_kernel(x_ref, w1_ref, b1_ref, w2_ref, b2_ref, w3_ref, b3_ref,
                 out_ref):
    # TODO(synk): dropout is identity in eval mode; training-mode dropout not implemented.
    x = x_ref[...]
    n1 = w1_ref.shape[1]          # 384 (padded 300)
    n2 = w2_ref.shape[1]          # 128 (padded 100)

    # dense1 + tanh  (512 -> 384 padded; lanes 300..383 hold zero weights/bias)
    h1 = jnp.dot(x.astype(w1_ref.dtype), w1_ref[...],
                 preferred_element_type=jnp.float32) + b1_ref[...]
    x1 = jnp.tanh(h1).astype(out_ref.dtype)
    out_ref[:, :n1] = x1

    # dense2 + tanh  (384 -> 128 padded); consumes the stored-precision x1
    # (matches PyTorch semantics when activations are kept in reduced precision).
    h2 = jnp.dot(x1.astype(w2_ref.dtype), w2_ref[...],
                 preferred_element_type=jnp.float32) + b2_ref[...]
    x2 = jnp.tanh(h2).astype(out_ref.dtype)
    out_ref[:, n1:n1 + n2] = x2

    # out_proj  (128 -> 128 padded; lanes num_labels..127 are zero weights/bias)
    h3 = jnp.dot(x2.astype(w3_ref.dtype), w3_ref[...],
                 preferred_element_type=jnp.float32) + b3_ref[...]
    out_ref[:, n1 + n2:] = h3.astype(out_ref.dtype)


# ----------------------------------------------------------------------------
# Helpers
# ----------------------------------------------------------------------------
def _round_up(n, m):
    return (n + m - 1) // m * m


def _pad_to(x, shape):
    pads = [(0, t - s) for s, t in zip(x.shape, shape)]
    if any(p[1] for p in pads):
        return jnp.pad(x, pads)
    return x


def _min_sublane_rows(dtype):
    # Minimum row-tile so the output block meets the packed-dtype minimum tile:
    # 8 rows for f32, 16 for bf16, 32 for int8/fp8.
    return max(8, 32 // jnp.dtype(dtype).itemsize)


# ----------------------------------------------------------------------------
# One-time parameter preparation (call at model load, NOT per forward).
# ----------------------------------------------------------------------------
def prepare_head_params(w1, b1, w2, b2, w3, b3, *, weight_dtype=jnp.bfloat16):
    """Pad + cast head parameters once.

    Weights are stored [in, out] (transposed vs. torch's [out, in]) so the
    kernel computes x @ W.  Every feature dimension is zero-padded to a
    multiple of 128 (lane-dense MXU tiles and unmasked stores); padded lanes
    carry zero weights/bias so the math is unchanged.  Biases stay f32 so
    bias-add + tanh run on the f32 accumulator (v5e-safe).
    """
    d_in, h1_dim = w1.shape
    h2_dim = w2.shape[1]
    num_labels = w3.shape[1]

    D = _round_up(d_in, 128)          # 512
    H1 = _round_up(h1_dim, 128)       # 384
    H2 = _round_up(h2_dim, 128)       # 128
    NL = _round_up(num_labels, 128)   # 128

    return dict(
        w1=_pad_to(w1, (D, H1)).astype(weight_dtype),
        w2=_pad_to(w2, (H1, H2)).astype(weight_dtype),
        w3=_pad_to(w3, (H2, NL)).astype(weight_dtype),
        b1=_pad_to(b1.reshape(1, -1), (1, H1)).astype(jnp.float32),
        b2=_pad_to(b2.reshape(1, -1), (1, H2)).astype(jnp.float32),
        b3=_pad_to(b3.reshape(1, -1), (1, NL)).astype(jnp.float32),
        dims=(d_in, h1_dim, h2_dim, num_labels),
        padded_dims=(D, H1, H2, NL),
    )


# ----------------------------------------------------------------------------
# Forward wrapper
# ----------------------------------------------------------------------------
def wav2vec2_classification_head(features, params, *, block_m=512,
                                 out_dtype=None, slice_outputs=True):
    """features: [B, 512] float.  params: output of prepare_head_params()."""
    B, d_in = features.shape
    d_in_p, h1_dim, h2_dim, num_labels = params["dims"]
    D, H1, H2, NL = params["padded_dims"]
    assert d_in == d_in_p, "feature dim mismatch with prepared params"
    out_dtype = features.dtype if out_dtype is None else jnp.dtype(out_dtype)
    total = H1 + H2 + NL

    # Batch (row) tiling: as large as block_m allows, never below the per-dtype
    # minimum sublane tile, and for moderate batches capped at ~B/2 so the grid
    # has >= 2 steps (lets v7x megacore sharding use both TensorCores).
    min_tm = _min_sublane_rows(out_dtype)
    tm = min(block_m, _round_up(B, min_tm))
    if B >= 2 * min_tm:
        tm = min(tm, _round_up((B + 1) // 2, min_tm))
    Bp = _round_up(B, tm)
    xp = _pad_to(features, (Bp, D))

    grid = (Bp // tm,)
    resident = lambda arr: pl.BlockSpec(arr.shape, lambda i: (0, 0))
    tiled = lambda ncols: pl.BlockSpec((tm, ncols), lambda i: (i, 0))

    out_p = pl.pallas_call(
        _head_kernel,
        out_shape=jax.ShapeDtypeStruct((Bp, total), out_dtype),
        grid=grid,
        in_specs=[
            tiled(D),
            resident(params["w1"]), resident(params["b1"]),
            resident(params["w2"]), resident(params["b2"]),
            resident(params["w3"]), resident(params["b3"]),
        ],
        out_specs=tiled(total),   # single lane-dense output block per step
        compiler_params=pltpu.CompilerParams(
            dimension_semantics=("parallel",),      # shard row grid across TCs
            vmem_limit_bytes=32 * 1024 * 1024,      # room for tm up to ~1024
        ),
    )(xp, params["w1"], params["b1"], params["w2"], params["b2"],
      params["w3"], params["b3"])

    if slice_outputs:
        # Exact PyTorch shapes.  The non-128-aligned lane slices cost a
        # relayout copy; use slice_outputs=False when the consumer can handle
        # the padded widths.
        return (out_p[:B, :h1_dim],
                out_p[:B, H1:H1 + h2_dim],
                out_p[:B, H1 + H2:H1 + H2 + num_labels])
    # Fast path: row-slice only; column splits are 128-aligned (cheap).
    return (out_p[:B, :H1], out_p[:B, H1:H1 + H2], out_p[:B, H1 + H2:])


# ----------------------------------------------------------------------------
# Self-test
# ----------------------------------------------------------------------------
def _init_linear(key, fan_in, fan_out, dtype=jnp.float32):
    # Deterministic synthetic init (PyTorch-style uniform(-1/sqrt(fan_in), ...)).
    kw, kb = jax.random.split(key)
    bound = 1.0 / jnp.sqrt(jnp.asarray(fan_in, dtype))
    # Stored [in, out] (transposed vs. torch's [out, in]) for x @ W.
    w = jax.random.uniform(kw, (fan_in, fan_out), dtype, -bound, bound)
    b = jax.random.uniform(kb, (fan_out,), dtype, -bound, bound)
    return w, b


if __name__ == "__main__":
    key = jax.random.PRNGKey(0)
    k_feat, k1, k2, k3 = jax.random.split(key, 4)

    batch = 8
    num_labels = 5  # synthetic config.num_labels

    features = jax.random.normal(k_feat, (batch, 512), jnp.float32)
    w1, b1 = _init_linear(k1, 512, 300)
    w2, b2 = _init_linear(k2, 300, 100)
    w3, b3 = _init_linear(k3, 100, num_labels)

    # Plain-JAX reference (same math).
    r1 = jnp.tanh(features @ w1 + b1)
    r2 = jnp.tanh(r1 @ w2 + b2)
    r3 = r2 @ w3 + b3

    # --- f32-weight path (tightest check; MXU may evaluate f32 dots at bf16
    #     input precision by default, so allow ~1e-2 margin) -----------------
    params_f32 = prepare_head_params(w1, b1, w2, b2, w3, b3,
                                     weight_dtype=jnp.float32)
    x1, x2, x3 = wav2vec2_classification_head(features, params_f32)
    jax.block_until_ready((x1, x2, x3))
    assert x1.shape == (batch, 300)
    assert x2.shape == (batch, 100)
    assert x3.shape == (batch, num_labels)
    assert jnp.allclose(x1, r1, atol=1e-2, rtol=1e-2)
    assert jnp.allclose(x2, r2, atol=1e-2, rtol=1e-2)
    assert jnp.allclose(x3, r3, atol=1e-2, rtol=1e-2)

    # --- default path: bf16 weight storage (f32 accumulate / bias / tanh) ---
    params = prepare_head_params(w1, b1, w2, b2, w3, b3)  # bf16 weights
    y1, y2, y3 = wav2vec2_classification_head(features, params)
    jax.block_until_ready((y1, y2, y3))
    assert y3.shape == (batch, num_labels)
    assert jnp.allclose(y1, r1, atol=5e-2, rtol=5e-2)
    assert jnp.allclose(y3, r3, atol=5e-2, rtol=5e-2)

    # --- fast path: padded widths (row-slice only) + bf16 activations -------
    z1, z2, z3 = wav2vec2_classification_head(
        features, params, out_dtype=jnp.bfloat16, slice_outputs=False)
    jax.block_until_ready((z1, z2, z3))
    assert z1.shape == (batch, 384)
    assert z2.shape == (batch, 128)
    assert z3.shape == (batch, 128)
    assert jnp.allclose(z1[:, :300].astype(jnp.float32), r1, atol=5e-2, rtol=5e-2)
    assert jnp.allclose(z3[:, :num_labels].astype(jnp.float32), r3,
                        atol=5e-2, rtol=5e-2)

    print("KERNEL_OK")
</pallas_src>

<mosaic_0001>
module attributes {stable_mosaic.version = 11 : i64} {
  func.func @_head_kernel(%arg0: i32, %arg1: memref<8x512xf32, #tpu.memory_space<vmem>>, %arg2: memref<512x384xf32, #tpu.memory_space<vmem>>, %arg3: memref<1x384xf32, #tpu.memory_space<vmem>>, %arg4: memref<384x128xf32, #tpu.memory_space<vmem>>, %arg5: memref<1x128xf32, #tpu.memory_space<vmem>>, %arg6: memref<128x128xf32, #tpu.memory_space<vmem>>, %arg7: memref<1x128xf32, #tpu.memory_space<vmem>>, %arg8: memref<8x640xf32, #tpu.memory_space<vmem>>) attributes {dimension_semantics = [#tpu.dimension_semantics<parallel>], iteration_bounds = array<i64: 1>, scalar_prefetch = 0 : i64, scratch_operands = 0 : i64, tpu.core_type = #tpu.core_type<tc>, window_params = [{transform_indices = @transform_0, window_bounds = array<i64: 8, 512>}, {pipeline_mode = #tpu.pipeline_mode<synchronous>, transform_indices = @transform_1, window_bounds = array<i64: 512, 384>}, {pipeline_mode = #tpu.pipeline_mode<synchronous>, transform_indices = @transform_2, window_bounds = array<i64: 1, 384>}, {pipeline_mode = #tpu.pipeline_mode<synchronous>, transform_indices = @transform_3, window_bounds = array<i64: 384, 128>}, {pipeline_mode = #tpu.pipeline_mode<synchronous>, transform_indices = @transform_4, window_bounds = array<i64: 1, 128>}, {pipeline_mode = #tpu.pipeline_mode<synchronous>, transform_indices = @transform_5, window_bounds = array<i64: 128, 128>}, {pipeline_mode = #tpu.pipeline_mode<synchronous>, transform_indices = @transform_6, window_bounds = array<i64: 1, 128>}, {transform_indices = @transform_7, window_bounds = array<i64: 8, 640>}]} {
    %c0 = arith.constant 0 : index
    %c0_0 = arith.constant 0 : index
    %0 = vector.load %arg1[%c0, %c0_0] : memref<8x512xf32, #tpu.memory_space<vmem>>, vector<8x512xf32>
    %c0_1 = arith.constant 0 : index
    %c0_2 = arith.constant 0 : index
    %1 = vector.load %arg2[%c0_1, %c0_2] : memref<512x384xf32, #tpu.memory_space<vmem>>, vector<512x384xf32>
    %cst = arith.constant dense<0.000000e+00> : vector<8x384xf32>
    %2 = tpu.matmul %0, %1, %cst {dimension_numbers = #tpu.dot_dimension_numbers<[1], [0], [0], [1], [0, 0, 1, 1], [], []>} : vector<8x512xf32>, vector<512x384xf32>, vector<8x384xf32> -> vector<8x384xf32>
    %c0_3 = arith.constant 0 : index
    %c0_4 = arith.constant 0 : index
    %3 = vector.load %arg3[%c0_3, %c0_4] : memref<1x384xf32, #tpu.memory_space<vmem>>, vector<1x384xf32>
    %4 = vector.broadcast %3 : vector<1x384xf32> to vector<8x384xf32>
    %5 = arith.addf %2, %4 : vector<8x384xf32>
    %6 = math.tanh %5 : vector<8x384xf32>
    %c0_5 = arith.constant 0 : index
    %c0_6 = arith.constant 0 : index
    %7 = vector.load %arg8[%c0_5, %c0_6] : memref<8x640xf32, #tpu.memory_space<vmem>>, vector<8x384xf32>
    tpu.vector_store %arg8[%c0_5, %c0_6], %6 {strides = array<i32>} : memref<8x640xf32, #tpu.memory_space<vmem>>, vector<8x384xf32>,
    %c0_7 = arith.constant 0 : index
    %c0_8 = arith.constant 0 : index
    %8 = vector.load %arg4[%c0_7, %c0_8] : memref<384x128xf32, #tpu.memory_space<vmem>>, vector<384x128xf32>
    %cst_9 = arith.constant dense<0.000000e+00> : vector<8x128xf32>
    %9 = tpu.matmul %6, %8, %cst_9 {dimension_numbers = #tpu.dot_dimension_numbers<[1], [0], [0], [1], [0, 0, 1, 1], [], []>} : vector<8x384xf32>, vector<384x128xf32>, vector<8x128xf32> -> vector<8x128xf32>
    %c0_10 = arith.constant 0 : index
    %c0_11 = arith.constant 0 : index
    %10 = vector.load %arg5[%c0_10, %c0_11] : memref<1x128xf32, #tpu.memory_space<vmem>>, vector<1x128xf32>
    %11 = vector.broadcast %10 : vector<1x128xf32> to vector<8x128xf32>
    %12 = arith.addf %9, %11 : vector<8x128xf32>
    %13 = math.tanh %12 : vector<8x128xf32>
    %c0_12 = arith.constant 0 : index
    %c384 = arith.constant 384 : index
    %14 = vector.load %arg8[%c0_12, %c384] : memref<8x640xf32, #tpu.memory_space<vmem>>, vector<8x128xf32>
    tpu.vector_store %arg8[%c0_12, %c384], %13 {strides = array<i32>} : memref<8x640xf32, #tpu.memory_space<vmem>>, vector<8x128xf32>,
    %c0_13 = arith.constant 0 : index
    %c0_14 = arith.constant 0 : index
    %15 = vector.load %arg6[%c0_13, %c0_14] : memref<128x128xf32, #tpu.memory_space<vmem>>, vector<128x128xf32>
    %cst_15 = arith.constant dense<0.000000e+00> : vector<8x128xf32>
    %16 = tpu.matmul %13, %15, %cst_15 {dimension_numbers = #tpu.dot_dimension_numbers<[1], [0], [0], [1], [0, 0, 1, 1], [], []>} : vector<8x128xf32>, vector<128x128xf32>, vector<8x128xf32> -> vector<8x128xf32>
    %c0_16 = arith.constant 0 : index
    %c0_17 = arith.constant 0 : index
    %17 = vector.load %arg7[%c0_16, %c0_17] : memref<1x128xf32, #tpu.memory_space<vmem>>, vector<1x128xf32>
    %18 = vector.broadcast %17 : vector<1x128xf32> to vector<8x128xf32>
    %19 = arith.addf %16, %18 : vector<8x128xf32>
    %c0_18 = arith.constant 0 : index
    %c512 = arith.constant 512 : index
    %20 = vector.load %arg8[%c0_18, %c512] : memref<8x640xf32, #tpu.memory_space<vmem>>, vector<8x128xf32>
    tpu.vector_store %arg8[%c0_18, %c512], %19 {strides = array<i32>} : memref<8x640xf32, #tpu.memory_space<vmem>>, vector<8x128xf32>,
    return
  }
  func.func @transform_0(%arg0: i32) -> (i32, i32) {
    %c0_i32 = arith.constant 0 : i32
    %c0_i32_0 = arith.constant 0 : i32
    return %arg0, %c0_i32 : i32, i32
  }
  func.func @transform_1(%arg0: i32) -> (i32, i32) {
    %c0_i32 = arith.constant 0 : i32
    %c0_i32_0 = arith.constant 0 : i32
    %c0_i32_1 = arith.constant 0 : i32
    return %c0_i32, %c0_i32_0 : i32, i32
  }
  func.func @transform_2(%arg0: i32) -> (i32, i32) {
    %c0_i32 = arith.constant 0 : i32
    %c0_i32_0 = arith.constant 0 : i32
    %c0_i32_1 = arith.constant 0 : i32
    return %c0_i32, %c0_i32_0 : i32, i32
  }
  func.func @transform_3(%arg0: i32) -> (i32, i32) {
    %c0_i32 = arith.constant 0 : i32
    %c0_i32_0 = arith.constant 0 : i32
    %c0_i32_1 = arith.constant 0 : i32
    return %c0_i32, %c0_i32_0 : i32, i32
  }
  func.func @transform_4(%arg0: i32) -> (i32, i32) {
    %c0_i32 = arith.constant 0 : i32
    %c0_i32_0 = arith.constant 0 : i32
    %c0_i32_1 = arith.constant 0 : i32
    return %c0_i32, %c0_i32_0 : i32, i32
  }
  func.func @transform_5(%arg0: i32) -> (i32, i32) {
    %c0_i32 = arith.constant 0 : i32
    %c0_i32_0 = arith.constant 0 : i32
    %c0_i32_1 = arith.constant 0 : i32
    return %c0_i32, %c0_i32_0 : i32, i32
  }
  func.func @transform_6(%arg0: i32) -> (i32, i32) {
    %c0_i32 = arith.constant 0 : i32
    %c0_i32_0 = arith.constant 0 : i32
    %c0_i32_1 = arith.constant 0 : i32
    return %c0_i32, %c0_i32_0 : i32, i32
  }
  func.func @transform_7(%arg0: i32) -> (i32, i32) {
    %c0_i32 = arith.constant 0 : i32
    %c0_i32_0 = arith.constant 0 : i32
    return %arg0, %c0_i32 : i32, i32
  }
}

</mosaic_0001>

<bundles_post_ra>
// kernel: tpu_custom_call.1
= control target key start
LH: loop header
LB: loop body
LE: loop exit
PB: predicated region body
PF: predicated region fallthrough
CT: control target
= control target key end

     0   :  { %12 = vsyncpa [#allocation3], 0  ;;  %s996_s0 = inlined_call_operand.hbm [shape: f32[8,512], index: 0, kind: input, shape index: {}]   ;;  %s997_s1 = inlined_call_operand.hbm [shape: f32[512,384], index: 1, kind: input, shape index: {}]   ;;  %s998_s2 = inlined_call_operand.hbm [shape: f32[1,384], index: 2, kind: input, shape index: {}]   ;;  %s999_s3 = inlined_call_operand.hbm [shape: f32[384,128], index: 3, kind: input, shape index: {}]   ;;  %s1000_s4 = inlined_call_operand.vmem [shape: f32[1,128], index: 4, kind: input, shape index: {}]   ;;  %s1001_s5 = inlined_call_operand.hbm [shape: f32[128,128], index: 5, kind: input, shape index: {}]   ;;  %s1002_s6 = inlined_call_operand.vmem [shape: f32[1,128], index: 6, kind: input, shape index: {}]   ;;  %s1003_s7 = inlined_call_operand.hbm [shape: f32[8,640], index: 7, kind: output, shape index: {}]  }
   0x1   :  { %13 = vsyncpa [#allocation6], 0 }
   0x2   :  { %14 = vsyncpa [#allocation9], 0  ;;  %s31_s26 = sshll.u32 %s997_s1, 4  ;;  %s32_s26 = int_to_ptr.hbm [resolvable:$true] %s31_s26 }
   0x3   :  { %15 = vsyncpa [#allocation4], 0  ;;  %s897_s27 = smov [#allocation5]   ;;  %s55_s8 = sshll.u32 %s999_s3, 4  ;;  %s56_s8 = int_to_ptr.hbm [resolvable:$true] %s55_s8 }
   0x4   :  { %s33_s28 = sshll.u32 %s897_s27, 4  ;;  %s898_s9 = smov 384   ;;  %s34_s28 = int_to_ptr.vmem [resolvable:$true] %s33_s28 }
   0x5   :  { %s899_s10 = smov 24   ;;  %s900_s11 = smov [#allocation8]  }
   0x6   :  { %39 = dma.hbm_to_vmem [thread:$0]  %s32_s26, 24576, %s34_s28, [#allocation6], %s898_s9, %s898_s9, %s899_s10  }
   0x7   :  { %s57_s12 = sshll.u32 %s900_s11, 4  ;;  %s901_s13 = smov 128   ;;  %s58_s12 = int_to_ptr.vmem [resolvable:$true] %s57_s12 }
   0x8   :  { %s902_s14 = smov 8   ;;  %s21_s16 = sshll.u32 %s996_s0, 4  ;;  %s22_s16 = int_to_ptr.hbm [resolvable:$true] %s21_s16 }
   0x9   :  { %63 = dma.hbm_to_vmem [thread:$0]  %s56_s8, 6144, %s58_s12, [#allocation9], %s901_s13, %s901_s13, %s902_s14  }
   0xa   :  { %s903_s17 = smov [#allocation2]   ;;  %s45_s20 = sshll.u32 %s998_s2, 4  ;;  %s46_s20 = int_to_ptr.hbm [resolvable:$true] %s45_s20 }
   0xb   :  { %s23_s18 = sshll.u32 %s903_s17, 4  ;;  %s904_s21 = smov [#allocation7]   ;;  %s24_s18 = int_to_ptr.vmem [resolvable:$true] %s23_s18 }
   0xc   :  { %26 = dma.hbm_to_vmem [thread:$0]  %s22_s16, 512, %s24_s18, [#allocation3]  }
   0xd   :  { %s47_s22 = sshll.u32 %s904_s21, 4  ;;  %s70_s25 = sshll.u32 %s1001_s5, 4  ;;  %s48_s22 = int_to_ptr.vmem [resolvable:$true] %s47_s22  ;;  %s71_s25 = int_to_ptr.hbm [resolvable:$true] %s70_s25 }
   0xe   :  { %50 = dma.hbm_to_vmem [thread:$0]  %s46_s20, 48, %s48_s22, [#allocation6]  }
   0xf   :  { %s905_s0 = smov [#allocation10]  }
  0x10   :  { %s72_s26 = sshll.u32 %s905_s0, 4  ;;  %s73_s26 = int_to_ptr.vmem [resolvable:$true] %s72_s26 }
  0x11   :  { %78 = dma.hbm_to_vmem [thread:$0]  %s71_s25, 2048, %s73_s26, [#allocation9], %s901_s13, %s901_s13, %s902_s14  }
  0x12   :  { %889 = dma.done.wait [#allocation3], 512  }
  0x13   :  { %890 = vsyncadd [#allocation3], 4294966784 }
  0x14   :  { %891 = dma.done.wait [#allocation6], 24624  }
  0x15   :  { %892 = vsyncadd [#allocation6], 4294942672 }
  0x16   :  { %893 = dma.done.wait [#allocation9], 8192  }
  0x17   :  { %894 = vsyncadd [#allocation9], 4294959104  ;;  %v246_v0 = vld [vmem:[#allocation5 + $0x468] sm:$0xff]  ;;  %v243_v2 = vld [vmem:[#allocation5 + $0x450] sm:$0xff]  ;;  %s906_s29 = smov [#allocation11]  }
  0x18   :  { %v150_v1 = vld [vmem:[#allocation5 + $0x168] sm:$0xff]  ;;  %345 = vmatpush.msra.mxu2 %v246_v0  ;;  %v147_v4 = vld [vmem:[#allocation5 + $0x150] sm:$0xff]  ;;  %v240_v6 = vld [vmem:[#allocation5 + $0x438] sm:$0xff]  ;;  %s711_s30 = sshll.u32 %s906_s29, 4  ;;  %s712_s30 = int_to_ptr.vmem [resolvable:$true] %s711_s30 }
  0x19   :  { %305 = vmatpush.msra.mxu0 %v150_v1  ;;  %v294_v3 = vld [vmem:[#allocation5 + $0x5e8] sm:$0xff]  ;;  %v291_v7 = vld [vmem:[#allocation5 + $0x5d0] sm:$0xff]  ;;  %v144_v8 = vld [vmem:[#allocation5 + $0x138] sm:$0xff] }
  0x1a   :  { %v198_v5 = vld [vmem:[#allocation5 + $0x2e8] sm:$0xff]  ;;  %365 = vmatpush.msra.mxu3 %v294_v3  ;;  %346 = vmatpush.msra.mxu2 %v243_v2  ;;  %v195_v9 = vld [vmem:[#allocation5 + $0x2d0] sm:$0xff]  ;;  %v288_v10 = vld [vmem:[#allocation5 + $0x5b8] sm:$0xff] }
  0x1b   :  { %325 = vmatpush.msra.mxu1 %v198_v5  ;;  %306 = vmatpush.msra.mxu0 %v147_v4  ;;  %v237_v11 = vld [vmem:[#allocation5 + $0x420] sm:$0xff]  ;;  %v192_v13 = vld [vmem:[#allocation5 + $0x2b8] sm:$0xff]  ;;  %v234_v16 = vld [vmem:[#allocation5 + $0x408] sm:$0xff] }
  0x1c   :  { %366 = vmatpush.msra.mxu3 %v291_v7  ;;  %v141_v12 = vld [vmem:[#allocation5 + $0x120] sm:$0xff]  ;;  %347 = vmatpush.msra.mxu2 %v240_v6  ;;  %v138_v17 = vld [vmem:[#allocation5 + $0x108] sm:$0xff]  ;;  %v231_v20 = vld [vmem:[#allocation5 + $0x3f0] sm:$0xff] }
  0x1d   :  { %326 = vmatpush.msra.mxu1 %v195_v9  ;;  %307 = vmatpush.msra.mxu0 %v144_v8  ;;  %v285_v14 = vld [vmem:[#allocation5 + $0x5a0] sm:$0xff]  ;;  %v282_v18 = vld [vmem:[#allocation5 + $0x588] sm:$0xff]  ;;  %v135_v21 = vld [vmem:[#allocation5 + $0xf0] sm:$0xff] }
  0x1e   :  { %v189_v15 = vld [vmem:[#allocation5 + $0x2a0] sm:$0xff]  ;;  %367 = vmatpush.msra.mxu3 %v288_v10  ;;  %348 = vmatpush.msra.mxu2 %v237_v11  ;;  %v186_v19 = vld [vmem:[#allocation5 + $0x288] sm:$0xff]  ;;  %v279_v22 = vld [vmem:[#allocation5 + $0x570] sm:$0xff] }
  0x1f   :  { %327 = vmatpush.msra.mxu1 %v192_v13  ;;  %308 = vmatpush.msra.mxu0 %v141_v12  ;;  %v183_v23 = vld [vmem:[#allocation5 + $0x270] sm:$0xff]  ;;  %v228_v24 = vld [vmem:[#allocation5 + $0x3d8] sm:$0xff]  ;;  %v225_v28 = vld [vmem:[#allocation5 + $0x3c0] sm:$0xff] }
  0x20   :  { %368 = vmatpush.msra.mxu3 %v285_v14  ;;  %349 = vmatpush.msra.mxu2 %v234_v16  ;;  %v132_v25 = vld [vmem:[#allocation5 + $0xd8] sm:$0xff]  ;;  %v129_v29 = vld [vmem:[#allocation5 + $0xc0] sm:$0xff]  ;;  %v222_v32 = vld [vmem:[#allocation5 + $0x3a8] sm:$0xff] }
  0x21   :  { %328 = vmatpush.msra.mxu1 %v189_v15  ;;  %309 = vmatpush.msra.mxu0 %v138_v17  ;;  %v276_v26 = vld [vmem:[#allocation5 + $0x558] sm:$0xff]  ;;  %v273_v30 = vld [vmem:[#allocation5 + $0x540] sm:$0xff]  ;;  %v126_v33 = vld [vmem:[#allocation5 + $0xa8] sm:$0xff] }
  0x22   :  { %369 = vmatpush.msra.mxu3 %v282_v18  ;;  %350 = vmatpush.msra.mxu2 %v231_v20  ;;  %v180_v27 = vld [vmem:[#allocation5 + $0x258] sm:$0xff]  ;;  %v177_v31 = vld [vmem:[#allocation5 + $0x240] sm:$0xff]  ;;  %v270_v34 = vld [vmem:[#allocation5 + $0x528] sm:$0xff] }
  0x23   :  { %329 = vmatpush.msra.mxu1 %v186_v19  ;;  %310 = vmatpush.msra.mxu0 %v135_v21  ;;  %v174_v35 = vld [vmem:[#allocation5 + $0x228] sm:$0xff]  ;;  %v219_v36 = vld [vmem:[#allocation5 + $0x390] sm:$0xff]  ;;  %v216_v40 = vld [vmem:[#allocation5 + $0x378] sm:$0xff] }
  0x24   :  { %370 = vmatpush.msra.mxu3 %v279_v22  ;;  %351 = vmatpush.msra.mxu2 %v228_v24  ;;  %v123_v37 = vld [vmem:[#allocation5 + $0x90] sm:$0xff]  ;;  %v120_v41 = vld [vmem:[#allocation5 + $0x78] sm:$0xff]  ;;  %v213_v44 = vld [vmem:[#allocation5 + $0x360] sm:$0xff] }
  0x25   :  { %330 = vmatpush.msra.mxu1 %v183_v23  ;;  %311 = vmatpush.msra.mxu0 %v132_v25  ;;  %v267_v38 = vld [vmem:[#allocation5 + $0x510] sm:$0xff]  ;;  %v264_v42 = vld [vmem:[#allocation5 + $0x4f8] sm:$0xff]  ;;  %v117_v45 = vld [vmem:[#allocation5 + $0x60] sm:$0xff] }
  0x26   :  { %371 = vmatpush.msra.mxu3 %v276_v26  ;;  %352 = vmatpush.msra.mxu2 %v225_v28  ;;  %v171_v39 = vld [vmem:[#allocation5 + $0x210] sm:$0xff]  ;;  %v168_v43 = vld [vmem:[#allocation5 + $0x1f8] sm:$0xff]  ;;  %v261_v46 = vld [vmem:[#allocation5 + $0x4e0] sm:$0xff] }
  0x27   :  { %331 = vmatpush.msra.mxu1 %v180_v27  ;;  %312 = vmatpush.msra.mxu0 %v129_v29  ;;  %v165_v47 = vld [vmem:[#allocation5 + $0x1e0] sm:$0xff]  ;;  %v210_v48 = vld [vmem:[#allocation5 + $0x348] sm:$0xff]  ;;  %v207_v52 = vld [vmem:[#allocation5 + $0x330] sm:$0xff] }
  0x28   :  { %372 = vmatpush.msra.mxu3 %v273_v30  ;;  %353 = vmatpush.msra.mxu2 %v222_v32  ;;  %v114_v49 = vld [vmem:[#allocation5 + $0x48] sm:$0xff]  ;;  %v111_v53 = vld [vmem:[#allocation5 + $0x30] sm:$0xff]  ;;  %v204_v56 = vld [vmem:[#allocation5 + $0x318] sm:$0xff] }
  0x29   :  { %332 = vmatpush.msra.mxu1 %v177_v31  ;;  %313 = vmatpush.msra.mxu0 %v126_v33  ;;  %v258_v50 = vld [vmem:[#allocation5 + $0x4c8] sm:$0xff]  ;;  %v255_v54 = vld [vmem:[#allocation5 + $0x4b0] sm:$0xff]  ;;  %v108_v57 = vld [vmem:[#allocation5 + $0x18] sm:$0xff] }
  0x2a   :  { %373 = vmatpush.msra.mxu3 %v270_v34  ;;  %354 = vmatpush.msra.mxu2 %v219_v36  ;;  %v162_v51 = vld [vmem:[#allocation5 + $0x1c8] sm:$0xff]  ;;  %v159_v55 = vld [vmem:[#allocation5 + $0x1b0] sm:$0xff]  ;;  %v252_v58 = vld [vmem:[#allocation5 + $0x498] sm:$0xff] }
  0x2b   :  { %333 = vmatpush.msra.mxu1 %v174_v35  ;;  %314 = vmatpush.msra.mxu0 %v123_v37  ;;  %v156_v59 = vld [vmem:[#allocation5 + $0x198] sm:$0xff]  ;;  %v201_v60 = vld [vmem:[#allocation5 + $0x300] sm:$0xff]  ;;  %v247_v62 = vld [vmem:[#allocation5 + $0x470] sm:$0xff] }
  0x2c   :  { %374 = vmatpush.msra.mxu3 %v267_v38  ;;  %355 = vmatpush.msra.mxu2 %v216_v40  ;;  %v105_v61 = vld [vmem:[#allocation5] sm:$0xff]  ;;  %v151_v0 = vld [vmem:[#allocation5 + $0x170] sm:$0xff]  ;;  %v244_v2 = vld [vmem:[#allocation5 + $0x458] sm:$0xff] }
  0x2d   :  { %334 = vmatpush.msra.mxu1 %v171_v39  ;;  %315 = vmatpush.msra.mxu0 %v120_v41  ;;  %v249_v63 = vld [vmem:[#allocation5 + $0x480] sm:$0xff]  ;;  %v295_v1 = vld [vmem:[#allocation5 + $0x5f0] sm:$0xff]  ;;  %v148_v4 = vld [vmem:[#allocation5 + $0x158] sm:$0xff] }
  0x2e   :  { %375 = vmatpush.msra.mxu3 %v264_v42  ;;  %356 = vmatpush.msra.mxu2 %v213_v44  ;;  %v153_v3 = vld [vmem:[#allocation5 + $0x180] sm:$0xff]  ;;  %v199_v5 = vld [vmem:[#allocation5 + $0x2f0] sm:$0xff]  ;;  %v292_v7 = vld [vmem:[#allocation5 + $0x5d8] sm:$0xff] }
  0x2f   :  { %335 = vmatpush.msra.mxu1 %v168_v43  ;;  %316 = vmatpush.msra.mxu0 %v117_v45  ;;  %v241_v6 = vld [vmem:[#allocation5 + $0x440] sm:$0xff]  ;;  %v196_v9 = vld [vmem:[#allocation5 + $0x2d8] sm:$0xff]  ;;  %v238_v10 = vld [vmem:[#allocation5 + $0x428] sm:$0xff] }
  0x30   :  { %376 = vmatpush.msra.mxu3 %v261_v46  ;;  %357 = vmatpush.msra.mxu2 %v210_v48  ;;  %v145_v8 = vld [vmem:[#allocation5 + $0x140] sm:$0xff]  ;;  %v142_v12 = vld [vmem:[#allocation5 + $0x128] sm:$0xff]  ;;  %v235_v14 = vld [vmem:[#allocation5 + $0x410] sm:$0xff] }
  0x31   :  { %336 = vmatpush.msra.mxu1 %v165_v47  ;;  %317 = vmatpush.msra.mxu0 %v114_v49  ;;  %v289_v11 = vld [vmem:[#allocation5 + $0x5c0] sm:$0xff]  ;;  %v286_v15 = vld [vmem:[#allocation5 + $0x5a8] sm:$0xff]  ;;  %v139_v16 = vld [vmem:[#allocation5 + $0x110] sm:$0xff] }
  0x32   :  { %377 = vmatpush.msra.mxu3 %v258_v50  ;;  %358 = vmatpush.msra.mxu2 %v207_v52  ;;  %v193_v13 = vld [vmem:[#allocation5 + $0x2c0] sm:$0xff]  ;;  %v190_v17 = vld [vmem:[#allocation5 + $0x2a8] sm:$0xff]  ;;  %v232_v18 = vld [vmem:[#allocation5 + $0x3f8] sm:$0xff] }
  0x33   :  { %337 = vmatpush.msra.mxu1 %v162_v51  ;;  %318 = vmatpush.msra.mxu0 %v111_v53  ;;  %v283_v19 = vld [vmem:[#allocation5 + $0x590] sm:$0xff]  ;;  %v136_v20 = vld [vmem:[#allocation5 + $0xf8] sm:$0xff]  ;;  %v229_v22 = vld [vmem:[#allocation5 + $0x3e0] sm:$0xff] }
  0x34   :  { %378 = vmatpush.msra.mxu3 %v255_v54  ;;  %359 = vmatpush.msra.mxu2 %v204_v56  ;;  %v187_v21 = vld [vmem:[#allocation5 + $0x290] sm:$0xff]  ;;  %v280_v23 = vld [vmem:[#allocation5 + $0x578] sm:$0xff]  ;;  %v133_v24 = vld [vmem:[#allocation5 + $0xe0] sm:$0xff] }
  0x35   :  { %338 = vmatpush.msra.mxu1 %v159_v55  ;;  %319 = vmatpush.msra.mxu0 %v108_v57  ;;  %v184_v25 = vld [vmem:[#allocation5 + $0x278] sm:$0xff]  ;;  %v226_v26 = vld [vmem:[#allocation5 + $0x3c8] sm:$0xff]  ;;  %v277_v27 = vld [vmem:[#allocation5 + $0x560] sm:$0xff] }
  0x36   :  { %379 = vmatpush.msra.mxu3 %v252_v58  ;;  %360 = vmatpush.msra.mxu2 %v201_v60  ;;  %v130_v28 = vld [vmem:[#allocation5 + $0xc8] sm:$0xff]  ;;  %v181_v29 = vld [vmem:[#allocation5 + $0x260] sm:$0xff]  ;;  %v223_v30 = vld [vmem:[#allocation5 + $0x3b0] sm:$0xff] }
  0x37   :  { %339 = vmatpush.msra.mxu1 %v156_v59  ;;  %320 = vmatpush.msra.mxu0 %v105_v61  ;;  %v274_v31 = vld [vmem:[#allocation5 + $0x548] sm:$0xff]  ;;  %v127_v32 = vld [vmem:[#allocation5 + $0xb0] sm:$0xff]  ;;  %v220_v34 = vld [vmem:[#allocation5 + $0x398] sm:$0xff] }
  0x38   :  { %425 = vmatpush.msrb.mxu2 %v247_v62  ;;  %380 = vmatpush.msra.mxu3 %v249_v63  ;;  %v178_v33 = vld [vmem:[#allocation5 + $0x248] sm:$0xff]  ;;  %v271_v35 = vld [vmem:[#allocation5 + $0x530] sm:$0xff]  ;;  %v124_v36 = vld [vmem:[#allocation5 + $0x98] sm:$0xff] }
  0x39   :  { %385 = vmatpush.msrb.mxu0 %v151_v0  ;;  %340 = vmatpush.msra.mxu1 %v153_v3  ;;  %v175_v37 = vld [vmem:[#allocation5 + $0x230] sm:$0xff]  ;;  %v217_v38 = vld [vmem:[#allocation5 + $0x380] sm:$0xff]  ;;  %v268_v39 = vld [vmem:[#allocation5 + $0x518] sm:$0xff] }
  0x3a   :  { %445 = vmatpush.msrb.mxu3 %v295_v1  ;;  %426 = vmatpush.msrb.mxu2 %v244_v2  ;;  %v121_v40 = vld [vmem:[#allocation5 + $0x80] sm:$0xff]  ;;  %v172_v41 = vld [vmem:[#allocation5 + $0x218] sm:$0xff]  ;;  %v214_v42 = vld [vmem:[#allocation5 + $0x368] sm:$0xff] }
  0x3b   :  { %386 = vmatpush.msrb.mxu0 %v148_v4  ;;  %405 = vmatpush.msrb.mxu1 %v199_v5  ;;  %v265_v43 = vld [vmem:[#allocation5 + $0x500] sm:$0xff]  ;;  %v118_v44 = vld [vmem:[#allocation5 + $0x68] sm:$0xff]  ;;  %v211_v46 = vld [vmem:[#allocation5 + $0x350] sm:$0xff] }
  0x3c   :  { %427 = vmatpush.msrb.mxu2 %v241_v6  ;;  %446 = vmatpush.msrb.mxu3 %v292_v7  ;;  %v169_v45 = vld [vmem:[#allocation5 + $0x200] sm:$0xff]  ;;  %v262_v47 = vld [vmem:[#allocation5 + $0x4e8] sm:$0xff]  ;;  %v962_v48 = vld [vmem:[#allocation2 + $0x10] sm:$0xff] }
  0x3d   :  { %387 = vmatpush.msrb.mxu0 %v145_v8  ;;  %406 = vmatpush.msrb.mxu1 %v196_v9  ;;  %v115_v49 = vld [vmem:[#allocation5 + $0x50] sm:$0xff]  ;;  %v166_v50 = vld [vmem:[#allocation5 + $0x1e8] sm:$0xff]  ;;  %v208_v51 = vld [vmem:[#allocation5 + $0x338] sm:$0xff] }
  0x3e   :  { %428 = vmatpush.msrb.mxu2 %v238_v10  ;;  %447 = vmatpush.msrb.mxu3 %v289_v11  ;;  %v259_v52 = vld [vmem:[#allocation5 + $0x4d0] sm:$0xff]  ;;  %v964_v53 = vld [vmem:[#allocation2] sm:$0xff]  ;;  %v967_v54 = vld [vmem:[#allocation2 + $0x18] sm:$0xff] }
  0x3f   :  { %388 = vmatpush.msrb.mxu0 %v142_v12  ;;  %407 = vmatpush.msrb.mxu1 %v193_v13  ;;  %v112_v55 = vld [vmem:[#allocation5 + $0x38] sm:$0xff]  ;;  %v163_v56 = vld [vmem:[#allocation5 + $0x1d0] sm:$0xff]  ;;  %v205_v57 = vld [vmem:[#allocation5 + $0x320] sm:$0xff] }
  0x40   :  { %429 = vmatpush.msrb.mxu2 %v235_v14  ;;  %448 = vmatpush.msrb.mxu3 %v286_v15  ;;  %v256_v58 = vld [vmem:[#allocation5 + $0x4b8] sm:$0xff]  ;;  %v970_v59 = vld [vmem:[#allocation2 + $0x8] sm:$0xff]  ;;  %v109_v60 = vld [vmem:[#allocation5 + $0x20] sm:$0xff] }
  0x41   :  { %389 = vmatpush.msrb.mxu0 %v139_v16  ;;  %408 = vmatpush.msrb.mxu1 %v190_v17  ;;  %v160_v61 = vld [vmem:[#allocation5 + $0x1b8] sm:$0xff]  ;;  %v202_v62 = vld [vmem:[#allocation5 + $0x308] sm:$0xff]  ;;  %v253_v63 = vld [vmem:[#allocation5 + $0x4a0] sm:$0xff] }
  0x42   :  { %430 = vmatpush.msrb.mxu2 %v232_v18  ;;  %449 = vmatpush.msrb.mxu3 %v283_v19  ;;  %v248_v0 = vld [vmem:[#allocation5 + $0x478] sm:$0xff]  ;;  %v106_v1 = vld [vmem:[#allocation5 + $0x8] sm:$0xff]  ;;  %v157_v2 = vld [vmem:[#allocation5 + $0x1a0] sm:$0xff] }
  0x43   :  { %390 = vmatpush.msrb.mxu0 %v136_v20  ;;  %409 = vmatpush.msrb.mxu1 %v187_v21  ;;  %v250_v3 = vld [vmem:[#allocation5 + $0x488] sm:$0xff]  ;;  %v152_v4 = vld [vmem:[#allocation5 + $0x178] sm:$0xff]  ;;  %v245_v5 = vld [vmem:[#allocation5 + $0x460] sm:$0xff] }
  0x44   :  { %431 = vmatpush.msrb.mxu2 %v229_v22  ;;  %450 = vmatpush.msrb.mxu3 %v280_v23  ;;  %v296_v6 = vld [vmem:[#allocation5 + $0x5f8] sm:$0xff]  ;;  %v154_v7 = vld [vmem:[#allocation5 + $0x188] sm:$0xff]  ;;  %v149_v8 = vld [vmem:[#allocation5 + $0x160] sm:$0xff] }
  0x45   :  { %391 = vmatpush.msrb.mxu0 %v133_v24  ;;  %410 = vmatpush.msrb.mxu1 %v184_v25  ;;  %v200_v9 = vld [vmem:[#allocation5 + $0x2f8] sm:$0xff]  ;;  %v242_v10 = vld [vmem:[#allocation5 + $0x448] sm:$0xff]  ;;  %v293_v11 = vld [vmem:[#allocation5 + $0x5e0] sm:$0xff] }
  0x46   :  { %432 = vmatpush.msrb.mxu2 %v226_v26  ;;  %451 = vmatpush.msrb.mxu3 %v277_v27  ;;  %v146_v12 = vld [vmem:[#allocation5 + $0x148] sm:$0xff]  ;;  %v197_v13 = vld [vmem:[#allocation5 + $0x2e0] sm:$0xff]  ;;  %v239_v14 = vld [vmem:[#allocation5 + $0x430] sm:$0xff] }
  0x47   :  { %392 = vmatpush.msrb.mxu0 %v130_v28  ;;  %411 = vmatpush.msrb.mxu1 %v181_v29  ;;  %v290_v15 = vld [vmem:[#allocation5 + $0x5c8] sm:$0xff]  ;;  %v143_v16 = vld [vmem:[#allocation5 + $0x130] sm:$0xff]  ;;  %v236_v18 = vld [vmem:[#allocation5 + $0x418] sm:$0xff] }
  0x48   :  { %433 = vmatpush.msrb.mxu2 %v223_v30  ;;  %452 = vmatpush.msrb.mxu3 %v274_v31  ;;  %v194_v17 = vld [vmem:[#allocation5 + $0x2c8] sm:$0xff]  ;;  %v287_v19 = vld [vmem:[#allocation5 + $0x5b0] sm:$0xff]  ;;  %v140_v20 = vld [vmem:[#allocation5 + $0x118] sm:$0xff] }
  0x49   :  { %393 = vmatpush.msrb.mxu0 %v127_v32  ;;  %412 = vmatpush.msrb.mxu1 %v178_v33  ;;  %v191_v21 = vld [vmem:[#allocation5 + $0x2b0] sm:$0xff]  ;;  %v233_v22 = vld [vmem:[#allocation5 + $0x400] sm:$0xff]  ;;  %v284_v23 = vld [vmem:[#allocation5 + $0x598] sm:$0xff] }
  0x4a   :  { %434 = vmatpush.msrb.mxu2 %v220_v34  ;;  %453 = vmatpush.msrb.mxu3 %v271_v35  ;;  %v137_v24 = vld [vmem:[#allocation5 + $0x100] sm:$0xff]  ;;  %v188_v25 = vld [vmem:[#allocation5 + $0x298] sm:$0xff]  ;;  %v230_v26 = vld [vmem:[#allocation5 + $0x3e8] sm:$0xff] }
  0x4b   :  { %394 = vmatpush.msrb.mxu0 %v124_v36  ;;  %413 = vmatpush.msrb.mxu1 %v175_v37  ;;  %v281_v27 = vld [vmem:[#allocation5 + $0x580] sm:$0xff]  ;;  %v134_v28 = vld [vmem:[#allocation5 + $0xe8] sm:$0xff]  ;;  %v227_v30 = vld [vmem:[#allocation5 + $0x3d0] sm:$0xff] }
  0x4c   :  { %435 = vmatpush.msrb.mxu2 %v217_v38  ;;  %454 = vmatpush.msrb.mxu3 %v268_v39  ;;  %v185_v29 = vld [vmem:[#allocation5 + $0x280] sm:$0xff]  ;;  %v278_v31 = vld [vmem:[#allocation5 + $0x568] sm:$0xff]  ;;  %v131_v32 = vld [vmem:[#allocation5 + $0xd0] sm:$0xff] }
  0x4d   :  { %395 = vmatpush.msrb.mxu0 %v121_v40  ;;  %414 = vmatpush.msrb.mxu1 %v172_v41  ;;  %v182_v33 = vld [vmem:[#allocation5 + $0x268] sm:$0xff]  ;;  %v224_v34 = vld [vmem:[#allocation5 + $0x3b8] sm:$0xff]  ;;  %v275_v35 = vld [vmem:[#allocation5 + $0x550] sm:$0xff] }
  0x4e   :  { %436 = vmatpush.msrb.mxu2 %v214_v42  ;;  %455 = vmatpush.msrb.mxu3 %v265_v43  ;;  %v128_v36 = vld [vmem:[#allocation5 + $0xb8] sm:$0xff]  ;;  %v179_v37 = vld [vmem:[#allocation5 + $0x250] sm:$0xff]  ;;  %v221_v38 = vld [vmem:[#allocation5 + $0x3a0] sm:$0xff] }
  0x4f   :  { %396 = vmatpush.msrb.mxu0 %v118_v44  ;;  %415 = vmatpush.msrb.mxu1 %v169_v45  ;;  %v272_v39 = vld [vmem:[#allocation5 + $0x538] sm:$0xff]  ;;  %v125_v40 = vld [vmem:[#allocation5 + $0xa0] sm:$0xff]  ;;  %v218_v42 = vld [vmem:[#allocation5 + $0x388] sm:$0xff] }
  0x50   :  { %437 = vmatpush.msrb.mxu2 %v211_v46  ;;  %456 = vmatpush.msrb.mxu3 %v262_v47  ;;  %v176_v41 = vld [vmem:[#allocation5 + $0x238] sm:$0xff]  ;;  %v269_v43 = vld [vmem:[#allocation5 + $0x520] sm:$0xff]  ;;  %v122_v44 = vld [vmem:[#allocation5 + $0x88] sm:$0xff] }
  0x51   :  { %361 = vmatmul.f32.vlgmr.msra.gmra.mxu2 %v962_v48  ;;  %397 = vmatpush.msrb.mxu0 %v115_v49  ;;  %v173_v45 = vld [vmem:[#allocation5 + $0x220] sm:$0xff]  ;;  %v215_v46 = vld [vmem:[#allocation5 + $0x370] sm:$0xff]  ;;  %v266_v47 = vld [vmem:[#allocation5 + $0x508] sm:$0xff] }
  0x52   :  { %416 = vmatpush.msrb.mxu1 %v166_v50  ;;  %438 = vmatpush.msrb.mxu2 %v208_v51  ;;  %v119_v49 = vld [vmem:[#allocation5 + $0x70] sm:$0xff]  ;;  %v170_v50 = vld [vmem:[#allocation5 + $0x208] sm:$0xff]  ;;  %v212_v51 = vld [vmem:[#allocation5 + $0x358] sm:$0xff] }
  0x53   :  { %457 = vmatpush.msrb.mxu3 %v259_v52  ;;  %321 = vmatmul.f32.vlgmr.msra.gmra.mxu0 %v964_v53  ;;  %v263_v52 = vld [vmem:[#allocation5 + $0x4f0] sm:$0xff] }
  0x54   :  { %381 = vmatmul.f32.vlgmr.msra.gmra.mxu3 %v967_v54  ;;  %398 = vmatpush.msrb.mxu0 %v112_v55  ;;  %v116_v55 = vld [vmem:[#allocation5 + $0x58] sm:$0xff] }
  0x55   :  { %417 = vmatpush.msrb.mxu1 %v163_v56  ;;  %439 = vmatpush.msrb.mxu2 %v205_v57  ;;  %v167_v56 = vld [vmem:[#allocation5 + $0x1f0] sm:$0xff]  ;;  %v209_v57 = vld [vmem:[#allocation5 + $0x340] sm:$0xff] }
  0x56   :  { %458 = vmatpush.msrb.mxu3 %v256_v58  ;;  %341 = vmatmul.f32.vlgmr.msra.gmra.mxu1 %v970_v59  ;;  %v260_v58 = vld [vmem:[#allocation5 + $0x4d8] sm:$0xff] }
  0x57   :  { %399 = vmatpush.msrb.mxu0 %v109_v60  ;;  %418 = vmatpush.msrb.mxu1 %v160_v61  ;;  %v113_v60 = vld [vmem:[#allocation5 + $0x40] sm:$0xff]  ;;  %v164_v61 = vld [vmem:[#allocation5 + $0x1d8] sm:$0xff] }
  0x58   :  { %440 = vmatpush.msrb.mxu2 %v202_v62  ;;  %459 = vmatpush.msrb.mxu3 %v253_v63  ;;  %v206_v62 = vld [vmem:[#allocation5 + $0x328] sm:$0xff]  ;;  %v257_v63 = vld [vmem:[#allocation5 + $0x4c0] sm:$0xff] }
  0x59   :  { %400 = vmatpush.msrb.mxu0 %v106_v1  ;;  %419 = vmatpush.msrb.mxu1 %v157_v2  ;;  %v161_v1 = vld [vmem:[#allocation5 + $0x1c0] sm:$0xff]  ;;  %v203_v2 = vld [vmem:[#allocation5 + $0x310] sm:$0xff] }
  0x5a   :  { %505 = vmatpush.msra.mxu2 %v248_v0  ;;  %460 = vmatpush.msrb.mxu3 %v250_v3  ;;  %v110_v0 = vld [vmem:[#allocation5 + $0x28] sm:$0xff] }
  0x5b   :  { %441 = vmatmul.f32.vlgmr.msrb.gmra.mxu2 %v962_v48  ;;  %465 = vmatpush.msra.mxu0 %v152_v4  ;;  %v254_v3 = vld [vmem:[#allocation5 + $0x4a8] sm:$0xff]  ;;  %v107_v4 = vld [vmem:[#allocation5 + $0x10] sm:$0xff] }
  0x5c   :  { %506 = vmatpush.msra.mxu2 %v245_v5  ;;  %525 = vmatpush.msra.mxu3 %v296_v6  ;;  %v158_v5 = vld [vmem:[#allocation5 + $0x1a8] sm:$0xff]  ;;  %v251_v6 = vld [vmem:[#allocation5 + $0x490] sm:$0xff] }
  0x5d   :  { %420 = vmatpush.msrb.mxu1 %v154_v7  ;;  %401 = vmatmul.f32.vlgmr.msrb.gmra.mxu0 %v964_v53  ;;  %v155_v7 = vld [vmem:[#allocation5 + $0x190] sm:$0xff] }
  0x5e   :  { %461 = vmatmul.f32.vlgmr.msrb.gmra.mxu3 %v967_v54  ;;  %466 = vmatpush.msra.mxu0 %v149_v8  ;;  %v566_v8 = vld [vmem:[#allocation8 + $0x78] sm:$0xff] }
  0x5f   :  { %485 = vmatpush.msra.mxu1 %v200_v9  ;;  %507 = vmatpush.msra.mxu2 %v242_v10  ;;  %v565_v9 = vld [vmem:[#allocation8 + $0x70] sm:$0xff]  ;;  %v582_v10 = vld [vmem:[#allocation8 + $0xf8] sm:$0xff] }
  0x60   :  { %526 = vmatpush.msra.mxu3 %v293_v11  ;;  %421 = vmatmul.f32.vlgmr.msrb.gmra.mxu1 %v970_v59  ;;  %v564_v11 = vld [vmem:[#allocation8 + $0x68] sm:$0xff] }
  0x61   :  { %467 = vmatpush.msra.mxu0 %v146_v12  ;;  %486 = vmatpush.msra.mxu1 %v197_v13  ;;  %v581_v12 = vld [vmem:[#allocation8 + $0xf0] sm:$0xff]  ;;  %v580_v13 = vld [vmem:[#allocation8 + $0xe8] sm:$0xff] }
  0x62   :  { %508 = vmatpush.msra.mxu2 %v239_v14  ;;  %527 = vmatpush.msra.mxu3 %v290_v15  ;;  %v562_v14 = vld [vmem:[#allocation8 + $0x58] sm:$0xff]  ;;  %v579_v15 = vld [vmem:[#allocation8 + $0xe0] sm:$0xff] }
  0x63   :  { %468 = vmatpush.msra.mxu0 %v143_v16  ;;  %487 = vmatpush.msra.mxu1 %v194_v17  ;;  %v560_v16 = vld [vmem:[#allocation8 + $0x48] sm:$0xff]  ;;  %v559_v17 = vld [vmem:[#allocation8 + $0x40] sm:$0xff] }
  0x64   :  { %509 = vmatpush.msra.mxu2 %v236_v18  ;;  %528 = vmatpush.msra.mxu3 %v287_v19  ;;  %v576_v18 = vld [vmem:[#allocation8 + $0xc8] sm:$0xff]  ;;  %v558_v19 = vld [vmem:[#allocation8 + $0x38] sm:$0xff] }
  0x65   :  { %469 = vmatpush.msra.mxu0 %v140_v20  ;;  %488 = vmatpush.msra.mxu1 %v191_v21  ;;  %v575_v20 = vld [vmem:[#allocation8 + $0xc0] sm:$0xff]  ;;  %v557_v21 = vld [vmem:[#allocation8 + $0x30] sm:$0xff] }
  0x66   :  { %510 = vmatpush.msra.mxu2 %v233_v22  ;;  %529 = vmatpush.msra.mxu3 %v284_v23  ;;  %v574_v22 = vld [vmem:[#allocation8 + $0xb8] sm:$0xff]  ;;  %v556_v23 = vld [vmem:[#allocation8 + $0x28] sm:$0xff] }
  0x67   :  { %470 = vmatpush.msra.mxu0 %v137_v24  ;;  %489 = vmatpush.msra.mxu1 %v188_v25  ;;  %v573_v24 = vld [vmem:[#allocation8 + $0xb0] sm:$0xff]  ;;  %v555_v25 = vld [vmem:[#allocation8 + $0x20] sm:$0xff] }
  0x68   :  { %511 = vmatpush.msra.mxu2 %v230_v26  ;;  %530 = vmatpush.msra.mxu3 %v281_v27  ;;  %v572_v26 = vld [vmem:[#allocation8 + $0xa8] sm:$0xff]  ;;  %v554_v27 = vld [vmem:[#allocation8 + $0x18] sm:$0xff] }
  0x69   :  { %471 = vmatpush.msra.mxu0 %v134_v28  ;;  %490 = vmatpush.msra.mxu1 %v185_v29  ;;  %v571_v28 = vld [vmem:[#allocation8 + $0xa0] sm:$0xff]  ;;  %v553_v29 = vld [vmem:[#allocation8 + $0x10] sm:$0xff] }
  0x6a   :  { %512 = vmatpush.msra.mxu2 %v227_v30  ;;  %531 = vmatpush.msra.mxu3 %v278_v31  ;;  %v570_v30 = vld [vmem:[#allocation8 + $0x98] sm:$0xff]  ;;  %v552_v31 = vld [vmem:[#allocation8 + $0x8] sm:$0xff] }
  0x6b   :  { %472 = vmatpush.msra.mxu0 %v131_v32  ;;  %491 = vmatpush.msra.mxu1 %v182_v33  ;;  %v569_v32 = vld [vmem:[#allocation8 + $0x90] sm:$0xff]  ;;  %v551_v33 = vld [vmem:[#allocation8] sm:$0xff] }
  0x6c   :  { %513 = vmatpush.msra.mxu2 %v224_v34  ;;  %532 = vmatpush.msra.mxu3 %v275_v35  ;;  %v568_v34 = vld [vmem:[#allocation8 + $0x88] sm:$0xff]  ;;  %v982_v35 = vld [vmem:[#allocation7] sm:$0x7] }
  0x6d   :  { %473 = vmatpush.msra.mxu0 %v128_v36  ;;  %492 = vmatpush.msra.mxu1 %v179_v37  ;;  %v598_v36 = vld [vmem:[#allocation8 + $0x178] sm:$0xff]  ;;  %v567_v37 = vld [vmem:[#allocation8 + $0x80] sm:$0xff] }
  0x6e   :  { %514 = vmatpush.msra.mxu2 %v221_v38  ;;  %533 = vmatpush.msra.mxu3 %v272_v39  ;;  %v597_v38 = vld [vmem:[#allocation8 + $0x170] sm:$0xff]  ;;  %v596_v39 = vld [vmem:[#allocation8 + $0x168] sm:$0xff] }
  0x6f   :  { %474 = vmatpush.msra.mxu0 %v125_v40  ;;  %493 = vmatpush.msra.mxu1 %v176_v41  ;;  %v299_v40 = vperm.slane %v982_v35, 0  ;;  %v595_v41 = vld [vmem:[#allocation8 + $0x160] sm:$0xff] }
  0x70   :  { %515 = vmatpush.msra.mxu2 %v218_v42  ;;  %534 = vmatpush.msra.mxu3 %v269_v43  ;;  %v594_v43 = vld [vmem:[#allocation8 + $0x158] sm:$0xff] }
  0x71   :  { %475 = vmatpush.msra.mxu0 %v122_v44  ;;  %494 = vmatpush.msra.mxu1 %v173_v45  ;;  %v593_v45 = vld [vmem:[#allocation8 + $0x150] sm:$0xff] }
  0x72   :  { %516 = vmatpush.msra.mxu2 %v215_v46  ;;  %535 = vmatpush.msra.mxu3 %v266_v47 }
  0x73   :  { %476 = vmatpush.msra.mxu0 %v119_v49  ;;  %495 = vmatpush.msra.mxu1 %v170_v50  ;;  %v592_v50 = vld [vmem:[#allocation8 + $0x148] sm:$0xff] }
  0x74   :  { %517 = vmatpush.msra.mxu2 %v212_v51  ;;  %536 = vmatpush.msra.mxu3 %v263_v52  ;;  %v591_v52 = vld [vmem:[#allocation8 + $0x140] sm:$0xff] }
  0x75   :  { %477 = vmatpush.msra.mxu0 %v116_v55  ;;  %496 = vmatpush.msra.mxu1 %v167_v56  ;;  %v300_v56 = vperm.slane %v982_v35, 1 }
  0x76   :  { %518 = vmatpush.msra.mxu2 %v209_v57  ;;  %537 = vmatpush.msra.mxu3 %v260_v58 }
  0x77   :  { %478 = vmatpush.msra.mxu0 %v113_v60  ;;  %497 = vmatpush.msra.mxu1 %v164_v61  ;;  %v590_v60 = vld [vmem:[#allocation8 + $0x138] sm:$0xff] }
  0x78   :  { %519 = vmatpush.msra.mxu2 %v206_v62  ;;  %538 = vmatpush.msra.mxu3 %v257_v63  ;;  %v589_v62 = vld [vmem:[#allocation8 + $0x130] sm:$0xff] }
  0x79   :  { %479 = vmatpush.msra.mxu0 %v110_v0  ;;  %498 = vmatpush.msra.mxu1 %v161_v1 }
  0x7a   :  { %520 = vmatpush.msra.mxu2 %v203_v2  ;;  %539 = vmatpush.msra.mxu3 %v254_v3  ;;  %v588_v2 = vld [vmem:[#allocation8 + $0x128] sm:$0xff] }
  0x7b   :  { %521 = vmatmul.f32.vlgmr.msra.gmra.mxu2 %v962_v48  ;;  %480 = vmatpush.msra.mxu0 %v107_v4  ;;  %v563_v48 = vld [vmem:[#allocation8 + $0x60] sm:$0xff] }
  0x7c   :  { %499 = vmatpush.msra.mxu1 %v158_v5  ;;  %540 = vmatpush.msra.mxu3 %v251_v6  ;;  %v587_v5 = vld [vmem:[#allocation8 + $0x120] sm:$0xff] }
  0x7d   :  { %481 = vmatmul.f32.vlgmr.msra.gmra.mxu0 %v964_v53  ;;  %541 = vmatmul.f32.vlgmr.msra.gmra.mxu3 %v967_v54  ;;  %v561_v53 = vld [vmem:[#allocation8 + $0x50] sm:$0xff]  ;;  %v578_v54 = vld [vmem:[#allocation8 + $0xd8] sm:$0xff] }
  0x7e   :  { %500 = vmatpush.msra.mxu1 %v155_v7  ;;  %603 = vmatpush.msrb.mxu0 %v566_v8  ;;  %v586_v8 = vld [vmem:[#allocation8 + $0x118] sm:$0xff] }
  0x7f   :  { %501 = vmatmul.f32.vlgmr.msra.gmra.mxu1 %v970_v59  ;;  %v577_v59 = vld [vmem:[#allocation8 + $0xd0] sm:$0xff]  ;;  %643 = vmatpush.msrb.mxu2 %v598_v36 }
  0x80   :  { %604 = vmatpush.msrb.mxu0 %v565_v9  ;;  %623 = vmatpush.msrb.mxu1 %v582_v10  ;;  %v585_v9 = vld [vmem:[#allocation8 + $0x110] sm:$0xff]  ;;  %v584_v10 = vld [vmem:[#allocation8 + $0x108] sm:$0xff] }
  0x81   :  { %644 = vmatpush.msrb.mxu2 %v597_v38 }
  0x82   :  { %605 = vmatpush.msrb.mxu0 %v564_v11  ;;  %624 = vmatpush.msrb.mxu1 %v581_v12  ;;  %v583_v11 = vld [vmem:[#allocation8 + $0x100] sm:$0xff] }
  0x83   :  { %645 = vmatpush.msrb.mxu2 %v596_v39 }
  0x84   :  { %606 = vmatpush.msrb.mxu0 %v563_v48  ;;  %625 = vmatpush.msrb.mxu1 %v580_v13  ;;  %v301_v48 = vperm.slane %v982_v35, 2  ;;  %v735_v35 = vld [vmem:[%s1000_s4] ss:$0 sm:$0xff]  ;;  %s713_s4 = sshll.u32 %s1003_s7, 4  ;;  %s714_s4 = int_to_ptr.hbm [resolvable:$true] %s713_s4 }
  0x85   :  { %646 = vmatpush.msrb.mxu2 %v595_v41 }
  0x86   :  { %607 = vmatpush.msrb.mxu0 %v562_v14  ;;  %626 = vmatpush.msrb.mxu1 %v579_v15 }
  0x87   :  { %647 = vmatpush.msrb.mxu2 %v594_v43  ;;  %v736_v43 = vld [vmem:[%s1002_s6] ss:$0 sm:$0xff] }
  0x88   :  { %608 = vmatpush.msrb.mxu0 %v561_v53  ;;  %627 = vmatpush.msrb.mxu1 %v578_v54 }
  0x89   :  { %648 = vmatpush.msrb.mxu2 %v593_v45 }
  0x8a   :  { %609 = vmatpush.msrb.mxu0 %v560_v16  ;;  %628 = vmatpush.msrb.mxu1 %v577_v59 }
  0x8b   :  { %649 = vmatpush.msrb.mxu2 %v592_v50 }
  0x8c   :  { %610 = vmatpush.msrb.mxu0 %v559_v17  ;;  %629 = vmatpush.msrb.mxu1 %v576_v18 }
  0x8d   :  { %650 = vmatpush.msrb.mxu2 %v591_v52 }
  0x8e   :  { %611 = vmatpush.msrb.mxu0 %v558_v19  ;;  %630 = vmatpush.msrb.mxu1 %v575_v20  ;;  %v680_v19 = vld [vmem:[#allocation10 + $0x78] sm:$0xff]  ;;  %v679_v20 = vld [vmem:[#allocation10 + $0x70] sm:$0xff] }
  0x8f   :  { %651 = vmatpush.msrb.mxu2 %v590_v60  ;;  %685 = vmatpush.msrb.mxu3 %v680_v19 }
  0x90   :  { %612 = vmatpush.msrb.mxu0 %v557_v21  ;;  %631 = vmatpush.msrb.mxu1 %v574_v22  ;;  %v678_v21 = vld [vmem:[#allocation10 + $0x68] sm:$0xff]  ;;  %v677_v22 = vld [vmem:[#allocation10 + $0x60] sm:$0xff] }
  0x91   :  { %652 = vmatpush.msrb.mxu2 %v589_v62  ;;  %686 = vmatpush.msrb.mxu3 %v679_v20 }
  0x92   :  { %613 = vmatpush.msrb.mxu0 %v556_v23  ;;  %632 = vmatpush.msrb.mxu1 %v573_v24  ;;  %v676_v23 = vld [vmem:[#allocation10 + $0x58] sm:$0xff]  ;;  %v675_v24 = vld [vmem:[#allocation10 + $0x50] sm:$0xff] }
  0x93   :  { %653 = vmatpush.msrb.mxu2 %v588_v2  ;;  %687 = vmatpush.msrb.mxu3 %v678_v21 }
  0x94   :  { %614 = vmatpush.msrb.mxu0 %v555_v25  ;;  %633 = vmatpush.msrb.mxu1 %v572_v26  ;;  %v674_v25 = vld [vmem:[#allocation10 + $0x48] sm:$0xff]  ;;  %v673_v26 = vld [vmem:[#allocation10 + $0x40] sm:$0xff] }
  0x95   :  { %654 = vmatpush.msrb.mxu2 %v587_v5  ;;  %688 = vmatpush.msrb.mxu3 %v677_v22 }
  0x96   :  { %615 = vmatpush.msrb.mxu0 %v554_v27  ;;  %634 = vmatpush.msrb.mxu1 %v571_v28  ;;  %v672_v27 = vld [vmem:[#allocation10 + $0x38] sm:$0xff]  ;;  %v671_v28 = vld [vmem:[#allocation10 + $0x30] sm:$0xff] }
  0x97   :  { %655 = vmatpush.msrb.mxu2 %v586_v8  ;;  %689 = vmatpush.msrb.mxu3 %v676_v23 }
  0x98   :  { %616 = vmatpush.msrb.mxu0 %v553_v29  ;;  %635 = vmatpush.msrb.mxu1 %v570_v30  ;;  %v670_v29 = vld [vmem:[#allocation10 + $0x28] sm:$0xff]  ;;  %v669_v30 = vld [vmem:[#allocation10 + $0x20] sm:$0xff] }
  0x99   :  { %656 = vmatpush.msrb.mxu2 %v585_v9  ;;  %690 = vmatpush.msrb.mxu3 %v675_v24 }
  0x9a   :  { %617 = vmatpush.msrb.mxu0 %v552_v31  ;;  %636 = vmatpush.msrb.mxu1 %v569_v32  ;;  %v668_v31 = vld [vmem:[#allocation10 + $0x18] sm:$0xff]  ;;  %v667_v32 = vld [vmem:[#allocation10 + $0x10] sm:$0xff] }
  0x9b   :  { %657 = vmatpush.msrb.mxu2 %v584_v10  ;;  %691 = vmatpush.msrb.mxu3 %v674_v25 }
  0x9c   :  { %618 = vmatpush.msrb.mxu0 %v551_v33  ;;  %637 = vmatpush.msrb.mxu1 %v568_v34  ;;  %v666_v33 = vld [vmem:[#allocation10 + $0x8] sm:$0xff]  ;;  %v665_v34 = vld [vmem:[#allocation10] sm:$0xff] }
  0x9d   :  { %658 = vmatpush.msrb.mxu2 %v583_v11  ;;  %692 = vmatpush.msrb.mxu3 %v673_v26 }
  0x9e   :  { %638 = vmatpush.msrb.mxu1 %v567_v37 }
  0x9f   :  { %693 = vmatpush.msrb.mxu3 %v672_v27 }
  0xa1   :  { %694 = vmatpush.msrb.mxu3 %v671_v28 }
  0xa3   :  { %695 = vmatpush.msrb.mxu3 %v670_v29 }
  0xa5   :  { %696 = vmatpush.msrb.mxu3 %v669_v30 }
  0xa7   :  { %697 = vmatpush.msrb.mxu3 %v668_v31 }
  0xa9   :  { %698 = vmatpush.msrb.mxu3 %v667_v32 }
  0xab   :  { %699 = vmatpush.msrb.mxu3 %v666_v33 }
  0xad   :  { %700 = vmatpush.msrb.mxu3 %v665_v34 }
  0xd0   :  { %v322_v42 = vpop.f32.mrf.mxu0 }
  0xd1   :  { %v323_v44 = vadd.f32 %v322_v42, %v299_v40 }
  0xd3   :  { %v342_v46 = vpop.f32.mrf.mxu1 }
  0xd4   :  { %v343_v47 = vadd.f32 %v342_v46, %v323_v44  ;;  %v362_v49 = vpop.f32.mrf.mxu2 }
  0xd6   :  { %v363_v51 = vadd.f32 %v362_v49, %v343_v47 }
  0xd7   :  { %v382_v55 = vpop.f32.mrf.mxu3 }
  0xd8   :  { %v383_v57 = vadd.f32 %v382_v55, %v363_v51 }
  0xda   :  { %737 = vtanh.f32 %v383_v57  ;;  %v402_v58 = vpop.f32.mrf.mxu0 }
  0xdb   :  { %v403_v61 = vadd.f32 %v402_v58, %v300_v56 }
  0xdd   :  { %v422_v63 = vpop.f32.mrf.mxu1 }
  0xde   :  { %v423_v0 = vadd.f32 %v422_v63, %v403_v61  ;;  %v442_v1 = vpop.f32.mrf.mxu2 }
  0xe0   :  { %v738_v3 = vpop.eup %737  ;;  %v443_v4 = vadd.f32 %v442_v1, %v423_v0 }
  0xe1   :  { %548 = vst [vmem:[#allocation11] sm:$0xff] %v738_v3  ;;  %v462_v6 = vpop.f32.mrf.mxu3  ;;  %619 = vmatmul.f32.vlgmr.msrb.gmra.mxu0 %v738_v3 }
  0xe2   :  { %v463_v7 = vadd.f32 %v462_v6, %v443_v4 }
  0xe4   :  { %739 = vtanh.f32 %v463_v7 }
  0xea   :  { %v740_v12 = vpop.eup %739 }
  0xeb   :  { %549 = vst [vmem:[#allocation11 + $0x8] sm:$0xff] %v740_v12  ;;  %639 = vmatmul.f32.vlgmr.msrb.gmra.mxu1 %v740_v12 }
  0xfa   :  { %v482_v13 = vpop.f32.mrf.mxu0 }
  0xfb   :  { %v483_v14 = vadd.f32 %v482_v13, %v301_v48 }
  0xfc   :  { %v502_v15 = vpop.f32.mrf.mxu1 }
  0xfd   :  { %v503_v53 = vadd.f32 %v502_v15, %v483_v14 }
  0xfe   :  { %v522_v54 = vpop.f32.mrf.mxu2 }
  0xff   :  { %v523_v16 = vadd.f32 %v522_v54, %v503_v53 }
 0x100   :  { %v542_v59 = vpop.f32.mrf.mxu3 }
 0x101   :  { %v543_v17 = vadd.f32 %v542_v59, %v523_v16 }
 0x103   :  { %741 = vtanh.f32 %v543_v17 }
 0x109   :  { %v742_v18 = vpop.eup %741 }
 0x10a   :  { %550 = vst [vmem:[#allocation11 + $0x10] sm:$0xff] %v742_v18  ;;  %659 = vmatmul.f32.vlgmr.msrb.gmra.mxu2 %v742_v18 }
 0x15e   :  { %v620_v36 = vpop.f32.mrf.mxu0 }
 0x15f   :  { %v621_v37 = vadd.f32 %v735_v35, %v620_v36 }
 0x168   :  { %v640_v38 = vpop.f32.mrf.mxu1 }
 0x169   :  { %v641_v39 = vadd.f32 %v640_v38, %v621_v37 }
 0x18d   :  { %v660_v40 = vpop.f32.mrf.mxu2 }
 0x18e   :  { %v661_v41 = vadd.f32 %v660_v40, %v641_v39 }
 0x190   :  { %743 = vtanh.f32 %v661_v41 }
 0x196   :  { %v744_v42 = vpop.eup %743 }
 0x197   :  { %664 = vst [vmem:[#allocation11 + $0x18] sm:$0xff] %v744_v42  ;;  %701 = vmatmul.f32.vlgmr.msrb.gmra.mxu3 %v744_v42 }
 0x21a   :  { %v702_v44 = vpop.f32.mrf.mxu3 }
 0x21b   :  { %v703_v45 = vadd.f32 %v736_v43, %v702_v44 }
 0x21d   :  { %705 = vst [vmem:[#allocation11 + $0x20] sm:$0xff] %v703_v45 }
 0x21e   :  { %716 = dma.vmem_to_hbm [thread:$0]  %s712_s30, 640, %s714_s4, [#allocation4]  }
 0x21f   :  { %895 = dma.done.wait [#allocation4], 640  }
 0x220   :  { %896 = vsyncadd [#allocation4], 4294966656 }
 0x221   :  { %721 = vsyncpa [#allocation3], 1 }
 0x222   :  { %722 = vsyncpa [#allocation6], 1 }
 0x223   :  { %723 = vsyncpa [#allocation9], 1 }
 0x224   :  { %724 = vsyncpa [#allocation4], 1 }

</bundles_post_ra>
